<compile_context>
chip_gen: v7x
topology: tpu7x:2x2x1
jax: 0.10.0
libtpu: 0.0.40
codegen_flags: <defaults>
</compile_context>

<pallas_src>
import functools

import jax
import jax.numpy as jnp
from jax.experimental import pallas as pl
from jax.experimental.pallas import tpu as pltpu


def _round_up(x, m):
    return ((x + m - 1) // m) * m


def _pick_tile(dim_p, unit, max_tile):
    """Largest multiple of `unit` that divides dim_p and is <= max_tile."""
    best = unit
    for m in range(1, dim_p // unit + 1):
        t = m * unit
        if dim_p % t == 0 and t <= max_tile:
            best = t
    return best


def _vmem_cap():
    """Generation-aware VMEM ceiling (75% of physical; conservative fallback)."""
    try:
        return int(0.75 * pltpu.get_tpu_info().vmem_capacity_bytes)
    except Exception:
        return int(0.75 * 64 * 1024 * 1024)  # v7x-safe fallback


# --------------------------------------------------------------------------
# Single Dense layer kernel
# --------------------------------------------------------------------------

def _dense_kernel(x_ref, wt_ref, b_ref, o_ref, acc_ref):
    # Grid: (M tiles, N tiles, K tiles); K last ("arbitrary") so the output
    # block stays resident and acc_ref accumulates across K.
    k = pl.program_id(2)
    prod = jnp.dot(x_ref[...], wt_ref[...], preferred_element_type=jnp.float32)

    @pl.when(k == 0)
    def _():
        acc_ref[...] = prod                    # direct write, no zero-init+add

    @pl.when(k != 0)
    def _():
        acc_ref[...] += prod

    @pl.when(k == pl.num_programs(2) - 1)
    def _():
        acc = acc_ref[...] + b_ref[...]        # broadcast (1, tn) over rows
        out = jnp.maximum(acc, 0.1 * acc)      # LeakyReLU(0.1): 1 vmul + 1 vmax
        o_ref[...] = out.astype(o_ref.dtype)


def prepare_dense_params(w, b, compute_dtype=jnp.float32):
    """One-time prep: PyTorch W (out, in) -> padded W^T (Kp, Np), b -> (1, Np).

    Padding K/N to multiples of 128 (hardware lane width) happens here, once,
    so the per-call forward never touches the weight again.
    Set compute_dtype=jnp.bfloat16 for the fast MXU path (f32 accumulation).
    """
    N, K = w.shape
    Kp, Np = _round_up(K, 128), _round_up(N, 128)
    wt_p = jnp.pad(jnp.transpose(w), ((0, Kp - K), (0, Np - N))).astype(compute_dtype)
    b_p = jnp.pad(b, (0, Np - N)).reshape(1, Np).astype(jnp.float32)
    return wt_p, b_p


@functools.partial(
    jax.jit,
    static_argnames=("out_features", "tile_m", "tile_n", "tile_k", "weight_buffers"),
)
def dense_forward(x, wt_p, b_p, *, out_features=None,
                  tile_m=1024, tile_n=512, tile_k=1024, weight_buffers=2):
    """y = leaky_relu(x @ W^T + b, 0.1).

    x: (M, K); wt_p: (Kp, Np) pre-padded W^T; b_p: (1, Np) pre-padded bias.
    Accumulation is float32 regardless of input dtype. If out_features is
    given, the result is trimmed to (M, out_features); otherwise the padded
    width is returned (useful when chaining layers).
    """
    M, K = x.shape
    Kp, Np = wt_p.shape
    assert K <= Kp and b_p.shape == (1, Np)

    # Pad only to hardware minimums; tiles below divide the padded dims.
    Mp = _round_up(M, 8)
    tm = _pick_tile(Mp, 8, tile_m)
    tn = _pick_tile(Np, 128, tile_n)
    tk = _pick_tile(Kp, 128, tile_k)

    xp = x if (Mp == M and Kp == K) else jnp.pad(x, ((0, Mp - M), (0, Kp - K)))
    if xp.dtype != wt_p.dtype:
        xp = xp.astype(wt_p.dtype)             # e.g. bf16 compute path

    grid = (Mp // tm, Np // tn, Kp // tk)
    elt = jnp.dtype(wt_p.dtype).itemsize
    out_elt = jnp.dtype(x.dtype).itemsize
    wbuf = weight_buffers if weight_buffers > 2 else 2
    vmem_bytes = (
        2 * tm * tk * elt                      # x tiles (double buffered)
        + wbuf * tk * tn * elt                 # weight tiles
        + 2 * tn * 4                           # bias tiles
        + 2 * tm * tn * out_elt                # output tiles
        + tm * tn * 4                          # f32 accumulator scratch
    )
    vmem_limit = int(min(max(2 * vmem_bytes, 4 * 1024 * 1024), _vmem_cap()))

    if weight_buffers != 2:                    # deeper buffering (v5e)
        w_spec = pl.BlockSpec((tk, tn), lambda i, j, k: (k, j),
                              pipeline_mode=pl.Buffered(weight_buffers))
    else:
        w_spec = pl.BlockSpec((tk, tn), lambda i, j, k: (k, j))

    yp = pl.pallas_call(
        _dense_kernel,
        out_shape=jax.ShapeDtypeStruct((Mp, Np), x.dtype),
        grid_spec=pltpu.PrefetchScalarGridSpec(
            num_scalar_prefetch=0,
            grid=grid,
            in_specs=[
                pl.BlockSpec((tm, tk), lambda i, j, k: (i, k)),   # x
                w_spec,                                           # W^T
                pl.BlockSpec((1, tn), lambda i, j, k: (0, j)),    # bias
            ],
            out_specs=pl.BlockSpec((tm, tn), lambda i, j, k: (i, j)),
            scratch_shapes=[pltpu.VMEM((tm, tn), jnp.float32)],
        ),
        compiler_params=pltpu.CompilerParams(
            dimension_semantics=("parallel", "parallel", "arbitrary"),
            vmem_limit_bytes=vmem_limit,
        ),
    )(xp, wt_p, b_p)

    if out_features is None and Mp == M:
        return yp                              # keep lane-padded width for chaining
    n = out_features if out_features is not None else Np
    return yp[:M, :n]


# --------------------------------------------------------------------------
# Fused Consecutive (whole pod-NN MLP) kernel: one pallas_call, weights
# VMEM-resident, activations never round-trip through HBM between layers.
# --------------------------------------------------------------------------

def _mlp_kernel(x_ref, *refs, activations):
    o_ref = refs[-1]
    param_refs = refs[:-1]                     # w0, b0, w1, b1, ...
    n_layers = len(param_refs) // 2
    h = x_ref[...]
    for l in range(n_layers):
        wt = param_refs[2 * l][...]
        b = param_refs[2 * l + 1][...]
        h = jnp.dot(h.astype(wt.dtype), wt, preferred_element_type=jnp.float32) + b
        if activations[l]:
            h = jnp.maximum(h, 0.1 * h)        # LeakyReLU(0.1)
    o_ref[...] = h.astype(o_ref.dtype)


def prepare_consecutive_params(layers, compute_dtype=jnp.float32):
    """layers: sequence of (W, b) in PyTorch layout. Returns padded (W^T, b) pairs."""
    return tuple(prepare_dense_params(w, b, compute_dtype=compute_dtype)
                 for (w, b) in layers)


@functools.partial(
    jax.jit, static_argnames=("out_features", "activations", "tile_m"))
def consecutive_forward(x, params, *, out_features=None, activations=None,
                        tile_m=1024):
    """Fused MLP: y = D_L(... D_1(x)), each D = leaky_relu(h @ W^T + b, 0.1).

    params: tuple of (wt_p, b_p) pairs from prepare_consecutive_params.
    activations: per-layer bool tuple (False = Identity, like Dense(activation=None)).
    """
    M, K = x.shape
    n_layers = len(params)
    if activations is None:
        activations = (True,) * n_layers
    K0p = params[0][0].shape[0]
    NLp = params[-1][1].shape[1]
    assert K <= K0p
    for l in range(1, n_layers):
        assert params[l][0].shape[0] == params[l - 1][1].shape[1]

    Mp = _round_up(M, 8)
    tm = _pick_tile(Mp, 8, tile_m)
    xp = x if (Mp == M and K0p == K) else jnp.pad(x, ((0, Mp - M), (0, K0p - K)))
    if xp.dtype != params[0][0].dtype:
        xp = xp.astype(params[0][0].dtype)

    in_specs = [pl.BlockSpec((tm, K0p), lambda i: (i, 0))]
    flat_params = []
    weight_bytes = 0
    max_width = K0p
    for wt_p, b_p in params:
        Kl, Nl = wt_p.shape
        max_width = max(max_width, Nl)
        in_specs.append(pl.BlockSpec((Kl, Nl), lambda i: (0, 0)))   # resident
        in_specs.append(pl.BlockSpec((1, Nl), lambda i: (0, 0)))    # resident
        flat_params += [wt_p, b_p]
        weight_bytes += (wt_p.size * jnp.dtype(wt_p.dtype).itemsize
                         + b_p.size * 4)

    out_elt = jnp.dtype(x.dtype).itemsize
    vmem_bytes = (weight_bytes
                  + 2 * tm * K0p * jnp.dtype(xp.dtype).itemsize
                  + 2 * tm * NLp * out_elt
                  + 2 * tm * max_width * 4)    # intermediate activations (f32)
    vmem_limit = int(min(max(2 * vmem_bytes, 4 * 1024 * 1024), _vmem_cap()))

    yp = pl.pallas_call(
        functools.partial(_mlp_kernel, activations=tuple(activations)),
        out_shape=jax.ShapeDtypeStruct((Mp, NLp), x.dtype),
        grid_spec=pltpu.PrefetchScalarGridSpec(
            num_scalar_prefetch=0,
            grid=(Mp // tm,),
            in_specs=in_specs,
            out_specs=pl.BlockSpec((tm, NLp), lambda i: (i, 0)),
        ),
        compiler_params=pltpu.CompilerParams(
            dimension_semantics=("parallel",),
            vmem_limit_bytes=vmem_limit,
        ),
    )(xp, *flat_params)

    if out_features is None and Mp == M:
        return yp
    n = out_features if out_features is not None else NLp
    return yp[:M, :n]


# --------------------------------------------------------------------------
# References
# --------------------------------------------------------------------------

def dense_reference(x, w, b):
    y = x @ w.T + b
    return jnp.where(y >= 0, y, 0.1 * y)


def mlp_reference(x, layers, activations):
    h = x
    for (w, b), act in zip(layers, activations):
        h = h @ w.T + b
        if act:
            h = jnp.where(h >= 0, h, 0.1 * h)
    return h


# TODO(synk): training-side machinery of the module (LBFGS/Adam optimizers,
# He init, freeze/save/load) is framework code with no Pallas equivalent.

if __name__ == "__main__":
    key = jax.random.PRNGKey(0)
    keys = jax.random.split(key, 12)

    # --- 1) single small Dense layer (shapes implied by the module) ---
    batch, input_dim, output_dim = 8, 32, 32
    x = jax.random.normal(keys[0], (batch, input_dim), dtype=jnp.float32)
    w = jax.random.normal(keys[1], (output_dim, input_dim), dtype=jnp.float32) * (
        2.0 / input_dim) ** 0.5
    b = jax.random.normal(keys[2], (output_dim,), dtype=jnp.float32) * 0.01

    wt_p, b_p = prepare_dense_params(w, b)
    y = jax.block_until_ready(dense_forward(x, wt_p, b_p, out_features=output_dim))
    assert jnp.allclose(y, dense_reference(x, w, b), atol=1e-5, rtol=1e-5), \
        "mismatch (small Dense)"

    # --- 2) ragged multi-of-128 shape (pads only to 8/128, not tile size) ---
    M2, K2, N2 = 300, 200, 384
    x2 = jax.random.normal(keys[3], (M2, K2), dtype=jnp.float32)
    w2 = jax.random.normal(keys[4], (N2, K2), dtype=jnp.float32) * (2.0 / K2) ** 0.5
    b2 = jax.random.normal(keys[5], (N2,), dtype=jnp.float32) * 0.01

    wt2_p, b2_p = prepare_dense_params(w2, b2)
    y2 = jax.block_until_ready(dense_forward(x2, wt2_p, b2_p, out_features=N2))
    assert jnp.allclose(y2, dense_reference(x2, w2, b2), atol=1e-4, rtol=1e-4), \
        "mismatch (ragged Dense)"

    # --- 3) bf16 compute path (f32 accumulation), loose tolerance ---
    wt2_bf, b2_bf = prepare_dense_params(w2, b2, compute_dtype=jnp.bfloat16)
    y2_bf = jax.block_until_ready(dense_forward(x2, wt2_bf, b2_bf, out_features=N2))
    assert jnp.allclose(y2_bf, dense_reference(x2, w2, b2), atol=0.1, rtol=0.1), \
        "mismatch (bf16 Dense)"

    # --- 4) fused pod-NN MLP: Consecutive(Dense(8,32), Dense(32,32), Dense(32,4,None)) ---
    dims = (8, 32, 32, 4)
    acts = (True, True, False)                 # last layer: activation=None (Identity)
    layers = []
    for li in range(len(dims) - 1):
        wl = jax.random.normal(keys[6 + 2 * li], (dims[li + 1], dims[li]),
                               dtype=jnp.float32) * (2.0 / dims[li]) ** 0.5
        bl = jax.random.normal(keys[7 + 2 * li], (dims[li + 1],),
                               dtype=jnp.float32) * 0.01
        layers.append((wl, bl))

    x3 = jax.random.normal(keys[5], (16, dims[0]), dtype=jnp.float32)
    mlp_params = prepare_consecutive_params(layers)
    y3 = jax.block_until_ready(
        consecutive_forward(x3, mlp_params, out_features=dims[-1], activations=acts))
    assert jnp.allclose(y3, mlp_reference(x3, layers, acts), atol=1e-4, rtol=1e-4), \
        "mismatch (fused MLP)"

    print("KERNEL_OK")
</pallas_src>

<mosaic_0001>
module attributes {stable_mosaic.version = 11 : i64} {
  func.func @_dense_kernel(%arg0: i32, %arg1: i32, %arg2: i32, %arg3: memref<8x128xf32, #tpu.memory_space<vmem>>, %arg4: memref<128x128xf32, #tpu.memory_space<vmem>>, %arg5: memref<1x128xf32, #tpu.memory_space<vmem>>, %arg6: memref<8x128xf32, #tpu.memory_space<vmem>>, %arg7: memref<8x128xf32, #tpu.memory_space<vmem>>) attributes {dimension_semantics = [#tpu.dimension_semantics<parallel>, #tpu.dimension_semantics<parallel>, #tpu.dimension_semantics<arbitrary>], iteration_bounds = array<i64: 1, 1, 1>, scalar_prefetch = 0 : i64, scratch_operands = 1 : i64, tpu.core_type = #tpu.core_type<tc>, window_params = [{transform_indices = @transform_0, window_bounds = array<i64: 8, 128>}, {transform_indices = @transform_1, window_bounds = array<i64: 128, 128>}, {transform_indices = @transform_2, window_bounds = array<i64: 1, 128>}, {transform_indices = @transform_3, window_bounds = array<i64: 8, 128>}]} {
    %c0 = arith.constant 0 : index
    %c0_0 = arith.constant 0 : index
    %0 = vector.load %arg3[%c0, %c0_0] : memref<8x128xf32, #tpu.memory_space<vmem>>, vector<8x128xf32>
    %c0_1 = arith.constant 0 : index
    %c0_2 = arith.constant 0 : index
    %1 = vector.load %arg4[%c0_1, %c0_2] : memref<128x128xf32, #tpu.memory_space<vmem>>, vector<128x128xf32>
    %cst = arith.constant dense<0.000000e+00> : vector<8x128xf32>
    %2 = tpu.matmul %0, %1, %cst {dimension_numbers = #tpu.dot_dimension_numbers<[1], [0], [0], [1], [0, 0, 1, 1], [], []>} : vector<8x128xf32>, vector<128x128xf32>, vector<8x128xf32> -> vector<8x128xf32>
    %c0_i32 = arith.constant 0 : i32
    %3 = arith.cmpi eq, %arg2, %c0_i32 : i32
    %4 = arith.extui %3 : i1 to i32
    %c0_i32_3 = arith.constant 0 : i32
    %5 = arith.cmpi ne, %4, %c0_i32_3 : i32
    scf.if %5 {
      %c0_8 = arith.constant 0 : index
      %c0_9 = arith.constant 0 : index
      %12 = vector.load %arg7[%c0_8, %c0_9] : memref<8x128xf32, #tpu.memory_space<vmem>>, vector<8x128xf32>
      tpu.vector_store %arg7[%c0_8, %c0_9], %2 {strides = array<i32>} : memref<8x128xf32, #tpu.memory_space<vmem>>, vector<8x128xf32>,
    } else {
    }
    %c0_i32_4 = arith.constant 0 : i32
    %6 = arith.cmpi ne, %arg2, %c0_i32_4 : i32
    %7 = arith.extui %6 : i1 to i32
    %c0_i32_5 = arith.constant 0 : i32
    %8 = arith.cmpi ne, %7, %c0_i32_5 : i32
    scf.if %8 {
      %c0_8 = arith.constant 0 : index
      %c0_9 = arith.constant 0 : index
      %12 = vector.load %arg7[%c0_8, %c0_9] : memref<8x128xf32, #tpu.memory_space<vmem>>, vector<8x128xf32>
      %13 = arith.addf %12, %2 : vector<8x128xf32>
      %c0_10 = arith.constant 0 : index
      %c0_11 = arith.constant 0 : index
      %14 = vector.load %arg7[%c0_10, %c0_11] : memref<8x128xf32, #tpu.memory_space<vmem>>, vector<8x128xf32>
      tpu.vector_store %arg7[%c0_10, %c0_11], %13 {strides = array<i32>} : memref<8x128xf32, #tpu.memory_space<vmem>>, vector<8x128xf32>,
    } else {
    }
    %c0_i32_6 = arith.constant 0 : i32
    %9 = arith.cmpi eq, %arg2, %c0_i32_6 : i32
    %10 = arith.extui %9 : i1 to i32
    %c0_i32_7 = arith.constant 0 : i32
    %11 = arith.cmpi ne, %10, %c0_i32_7 : i32
    scf.if %11 {
      %c0_8 = arith.constant 0 : index
      %c0_9 = arith.constant 0 : index
      %12 = vector.load %arg7[%c0_8, %c0_9] : memref<8x128xf32, #tpu.memory_space<vmem>>, vector<8x128xf32>
      %c0_10 = arith.constant 0 : index
      %c0_11 = arith.constant 0 : index
      %13 = vector.load %arg5[%c0_10, %c0_11] : memref<1x128xf32, #tpu.memory_space<vmem>>, vector<1x128xf32>
      %14 = vector.broadcast %13 : vector<1x128xf32> to vector<8x128xf32>
      %15 = arith.addf %12, %14 : vector<8x128xf32>
      %cst_12 = arith.constant 1.000000e-01 : f32
      %16 = vector.broadcast %cst_12 : f32 to vector<8x128xf32>
      %17 = arith.mulf %16, %15 : vector<8x128xf32>
      %18 = arith.maximumf %15, %17 : vector<8x128xf32>
      %c0_13 = arith.constant 0 : index
      %c0_14 = arith.constant 0 : index
      %19 = vector.load %arg6[%c0_13, %c0_14] : memref<8x128xf32, #tpu.memory_space<vmem>>, vector<8x128xf32>
      tpu.vector_store %arg6[%c0_13, %c0_14], %18 {strides = array<i32>} : memref<8x128xf32, #tpu.memory_space<vmem>>, vector<8x128xf32>,
    } else {
    }
    return
  }
  func.func @transform_0(%arg0: i32, %arg1: i32, %arg2: i32) -> (i32, i32) {
    %c0_i32 = arith.constant 0 : i32
    return %arg0, %arg2 : i32, i32
  }
  func.func @transform_1(%arg0: i32, %arg1: i32, %arg2: i32) -> (i32, i32) {
    %c0_i32 = arith.constant 0 : i32
    return %arg2, %arg1 : i32, i32
  }
  func.func @transform_2(%arg0: i32, %arg1: i32, %arg2: i32) -> (i32, i32) {
    %c0_i32 = arith.constant 0 : i32
    %c0_i32_0 = arith.constant 0 : i32
    return %c0_i32, %arg1 : i32, i32
  }
  func.func @transform_3(%arg0: i32, %arg1: i32, %arg2: i32) -> (i32, i32) {
    %c0_i32 = arith.constant 0 : i32
    return %arg0, %arg1 : i32, i32
  }
}

</mosaic_0001>

<bundles_post_ra>
// kernel: dense_forward.1
= control target key start
LH: loop header
LB: loop body
LE: loop exit
PB: predicated region body
PF: predicated region fallthrough
CT: control target
= control target key end

     0   :  { %8 = vsyncpa [#allocation4], 0  ;;  %s347_s0 = inlined_call_operand.vmem [shape: f32[8,128], index: 0, kind: input, shape index: {}]   ;;  %s348_s1 = inlined_call_operand.hbm [shape: f32[128,128], index: 1, kind: input, shape index: {}]   ;;  %s349_s2 = inlined_call_operand.vmem [shape: f32[1,128], index: 2, kind: input, shape index: {}]   ;;  %s350_s3 = inlined_call_operand.hbm [shape: f32[8,128], index: 3, kind: output, shape index: {}]  }
   0x1   :  { %9 = vsyncpa [#allocation5], 0  ;;  %s290_s12 = smov [#allocation3]   ;;  %s242_s16 = scalar_lea.hbm %s348_s1, 2048 }
   0x2   :  { %s17_s13 = sshll.u32 %s290_s12, 4  ;;  %p243_p0 = scmp.ne.s32.totalorder %s348_s1, %s242_s16  ;;  %s18_s13 = int_to_ptr.vmem [resolvable:$true] %s17_s13 }
   0x3   :  { %p246_p1 = scmp.lt.u32.totalorder %s242_s16, %s348_s1 }
   0x5   :  { %p248_p2 = pnand %p246_p1, %p243_p0 }
   0x7   :  { %251 = shalt.err (!%p248_p2)
}
   0x8   :  { %s252_s21 = scalar_lea.vmem %s18_s13, 2048  ;;  %p257_p4 = scmp.lt.s32.totalorder %s18_s13, %s18_s13 }
   0x9   :  { %p253_p3 = scmp.ne.s32.totalorder %s18_s13, %s252_s21  ;;  %p258_p5 = scmp.lt.s32.totalorder %s252_s21, %s252_s21 }
   0xb   :  { %p259_p6 = por %p258_p5, %p257_p4 }
   0xd   :  { %p260_p7 = pnand %p259_p6, %p253_p3 }
   0xf   :  { %263 = shalt.err (!%p260_p7)
}
  0x10   :  { %s291_s22 = smov 128   ;;  %s292_s23 = smov 8  }
  0x11   :  { %23 = dma.hbm_to_vmem [thread:$0]  %s348_s1, 2048, %s18_s13, [#allocation4], %s291_s22, %s291_s22, %s292_s23  }
  0x12   :  { %286 = dma.done.wait [#allocation4], 2048  }
  0x13   :  { %287 = vsyncadd [#allocation4], 4294965248  ;;  %v293_v0 = vmov 0.0|0.0   ;;  %vm294_vm0 = vmmov 0   ;;  %v295_v1 = vmov 0.0   ;;  %v30_v2 = vld [vmem:[#allocation3] sm:$0xff] }
  0x14   :  { %211 = vmatprep.subr.bf16.mxu0 %v293_v0  ;;  %208 = vmatprep.mubr.msk.f32.mxu0 %vm294_vm0, %v295_v1  ;;  %v31_v3 = vld [vmem:[#allocation3 + $0x8] sm:$0xff]  ;;  %v32_v4 = vld [vmem:[#allocation3 + $0x10] sm:$0xff]  ;;  %v33_v6 = vld [vmem:[#allocation3 + $0x18] sm:$0xff]  ;;  %s296_s29 = smov [#allocation6]  }
  0x15   :  { %v212_v5 = vpack.c.bf16 %v31_v3, %v30_v2  ;;  %v215_v7 = vpack.c.bf16 %v33_v6, %v32_v4  ;;  %v34_v8 = vld [vmem:[#allocation3 + $0x20] sm:$0xff]  ;;  %v35_v9 = vld [vmem:[#allocation3 + $0x28] sm:$0xff]  ;;  %v36_v11 = vld [vmem:[#allocation3 + $0x30] sm:$0xff]  ;;  %s149_s30 = sshll.u32 %s296_s29, 4  ;;  %s150_s30 = int_to_ptr.vmem [resolvable:$true] %s149_s30 }
  0x16   :  { %v218_v10 = vpack.c.bf16 %v35_v9, %v34_v8  ;;  %v37_v12 = vld [vmem:[#allocation3 + $0x38] sm:$0xff]  ;;  %v38_v14 = vld [vmem:[#allocation3 + $0x40] sm:$0xff]  ;;  %v39_v15 = vld [vmem:[#allocation3 + $0x48] sm:$0xff]  ;;  %s264_s4 = scalar_lea.vmem %s150_s30, 128  ;;  %p269_p9 = scmp.lt.s32.totalorder %s150_s30, %s150_s30 }
  0x17   :  { %213 = vmatpush3.bf16.msra.mxu0 %v212_v5  ;;  %v221_v13 = vpack.c.bf16 %v37_v12, %v36_v11  ;;  %v224_v16 = vpack.c.bf16 %v39_v15, %v38_v14  ;;  %v40_v17 = vld [vmem:[#allocation3 + $0x50] sm:$0xff]  ;;  %v41_v18 = vld [vmem:[#allocation3 + $0x58] sm:$0xff]  ;;  %v42_v20 = vld [vmem:[#allocation3 + $0x60] sm:$0xff]  ;;  %p265_p8 = scmp.ne.s32.totalorder %s150_s30, %s264_s4  ;;  %p270_p10 = scmp.lt.s32.totalorder %s264_s4, %s264_s4 }
  0x18   :  { %214 = vmatprep.subr.bf16.mxu0 %v293_v0  ;;  %v227_v19 = vpack.c.bf16 %v41_v18, %v40_v17  ;;  %v43_v21 = vld [vmem:[#allocation3 + $0x68] sm:$0xff]  ;;  %v44_v23 = vld [vmem:[#allocation3 + $0x70] sm:$0xff]  ;;  %v45_v24 = vld [vmem:[#allocation3 + $0x78] sm:$0xff] }
  0x19   :  { %v230_v22 = vpack.c.bf16 %v43_v21, %v42_v20  ;;  %v233_v25 = vpack.c.bf16 %v45_v24, %v44_v23  ;;  %v29_v26 = vld [vmem:[%s347_s0] sm:$0xff]  ;;  %p271_p11 = por %p270_p10, %p269_p9 }
  0x1a   :  { %v158_v27 = vld [vmem:[%s349_s2] ss:$0 sm:$0xff] }
  0x1b   :  { %216 = vmatpush3.bf16.msra.mxu0 %v215_v7  ;;  %p272_p12 = pnand %p271_p11, %p265_p8 }
  0x1c   :  { %217 = vmatprep.subr.bf16.mxu0 %v293_v0 }
  0x1f   :  { %219 = vmatpush3.bf16.msra.mxu0 %v218_v10 }
  0x20   :  { %220 = vmatprep.subr.bf16.mxu0 %v293_v0 }
  0x23   :  { %222 = vmatpush3.bf16.msra.mxu0 %v221_v13 }
  0x24   :  { %223 = vmatprep.subr.bf16.mxu0 %v293_v0 }
  0x27   :  { %225 = vmatpush3.bf16.msra.mxu0 %v224_v16 }
  0x28   :  { %226 = vmatprep.subr.bf16.mxu0 %v293_v0 }
  0x2b   :  { %228 = vmatpush3.bf16.msra.mxu0 %v227_v19 }
  0x2c   :  { %229 = vmatprep.subr.bf16.mxu0 %v293_v0 }
  0x2f   :  { %231 = vmatpush3.bf16.msra.mxu0 %v230_v22 }
  0x30   :  { %232 = vmatprep.subr.bf16.mxu0 %v293_v0 }
  0x33   :  { %234 = vmatpush3.bf16.msra.mxu0 %v233_v25 }
  0x36   :  { %209 = vmatmul.mubr.f32.vlgmr.msra.gmra.mrb[0].mxu0 %v29_v26 }
 0x109   :  { %v112_v28 = vpop.f32.mrb[0].mxu0 }
 0x10a   :  { %v139_v29 = vadd.f32 %v158_v27, %v112_v28  ;;  %v210_v30 = vpop.f32.mrb[1].mxu0 }
 0x10c   :  { %v140_v31 = vmul.f32 0.1, %v139_v29 }
 0x10e   :  { %v141_v32 = vmax.f32 %v139_v29, %v140_v31 }
 0x110   :  { %142 = vst [vmem:[#allocation6] sm:$0xff] %v141_v32 }
 0x111   :  { %275 = shalt.err (!%p272_p12)
}
 0x112   :  { %s276_s2 = scalar_lea.hbm %s350_s3, 128 }
 0x113   :  { %p277_p13 = scmp.ne.s32.totalorder %s350_s3, %s276_s2  ;;  %p280_p0 = scmp.lt.u32.totalorder %s276_s2, %s350_s3 }
 0x115   :  { %p282_p1 = pnand %p280_p0, %p277_p13 }
 0x117   :  { %285 = shalt.err (!%p282_p1)
}
 0x118   :  { %152 = dma.vmem_to_hbm [thread:$0]  %s150_s30, 128, %s350_s3, [#allocation5]  }
 0x119   :  { %288 = dma.done.wait [#allocation5], 128  }
 0x11a   :  { %289 = vsyncadd [#allocation5], 4294967168 }
 0x11b   :  { %156 = vsyncpa [#allocation4], 1 }
 0x11c   :  { %157 = vsyncpa [#allocation5], 1 }

</bundles_post_ra>
